<compile_context>
chip_gen: v6e
topology: v6e:2x2x1
jax: 0.10.0
libtpu: 0.0.40
codegen_flags: <defaults>
</compile_context>

<pallas_src>
import jax
import jax.numpy as jnp
from jax.experimental import pallas as pl
from jax.experimental.pallas import tpu as pltpu


def _make_kernel(tb, rows_total, ragged):
    """Build the per-tile kernel.

    w_ref: (1, D)  f32 softmax-normalized weights (resident, constant block)
    x_ref: (TB, D) streamed batch tile (last tile may be a partial block)
    o_ref: (1, TB) f32 lane-dense per-row weighted sums
    """

    def kernel(w_ref, x_ref, o_ref):
        # Fused cast: bf16/f32 x times f32 w promotes per-vreg to f32 — no
        # standalone full-tile up-cast intermediate.
        prod = x_ref[...] * w_ref[...]                      # (TB, D) f32
        if ragged:
            # Zero out rows past the true batch size so the padded lanes of
            # the output hold defined values (they are sliced away anyway).
            row = pl.program_id(0) * tb + jax.lax.broadcasted_iota(
                jnp.int32, prod.shape, 0)
            prod = jnp.where(row < rows_total, prod, 0.0)
        row_sums = jnp.sum(prod, axis=-1)                   # (TB,) lane reduce
        o_ref[...] = row_sums[None, :].astype(o_ref.dtype)  # (1, TB) lane-dense

    return kernel


def _default_vmem_limit_bytes():
    """Generation-aware scoped-VMEM budget."""
    try:
        cap = int(pltpu.get_tpu_info().vmem_capacity_bytes)
    except Exception:
        return 48 << 20                 # unknown part: conservative default
    if cap <= (64 << 20):
        return 40 << 20                 # v7x-class: 64 MiB physical per TC
    return 64 << 20                     # v5e/v6e-class: 128 MiB physical


def _choose_batch_tile(batch, feat, itemsize, vmem_limit_bytes):
    """Pick the batch tile (multiple of 128) for the streamed x block.

    Sized so each grid step moves roughly 2-8 MiB of x (amortizes the ~0.35 us
    per-step overhead) while the double-buffered block plus its f32 compute
    intermediates fit comfortably in the scoped VMEM budget.  Also guarantees
    >= 2 grid steps when the batch allows it so both v7x TensorCores get work.
    """
    elem = max(itemsize, 4)             # account for f32 intermediates of bf16 x
    budget_rows = (vmem_limit_bytes // 3) // max(1, 2 * feat * elem)
    target_rows = (8 << 20) // max(1, feat * itemsize)      # ~8 MiB per step
    rows = min(budget_rows, target_rows)
    tb = max(128, (rows // 128) * 128)

    b_pad = ((batch + 127) // 128) * 128
    if b_pad >= 256:
        # Ensure at least 2 grid steps (megacore sharding on v7x); the extra
        # grid step costs ~0.35 us on single-TC parts — negligible.
        half = max(128, ((b_pad // 2) // 128) * 128)
        tb = min(tb, half)
    return min(tb, b_pad)


def attention_forward(x, attention_weights, *, tb=None, vmem_limit_bytes=None):
    """x: (B, D), attention_weights: (D,) -> (B,) f32 weighted sums over dim=1."""
    B, D = x.shape
    assert attention_weights.shape == (D,)

    if vmem_limit_bytes is None:
        vmem_limit_bytes = _default_vmem_limit_bytes()

    # Hoist the tiny O(D) softmax out of the grid loop; keep it in f32 so bf16
    # inputs don't double-round the weights.
    w2d = jax.nn.softmax(attention_weights.astype(jnp.float32), axis=0).reshape(1, D)

    if tb is None:
        tb = _choose_batch_tile(B, D, x.dtype.itemsize, vmem_limit_bytes)

    num_tiles = pl.cdiv(B, tb)
    ragged = (B % tb) != 0              # last x block is a partial block

    out = pl.pallas_call(
        _make_kernel(tb, B, ragged),
        out_shape=jax.ShapeDtypeStruct((1, num_tiles * tb), jnp.float32),
        grid_spec=pltpu.PrefetchScalarGridSpec(
            num_scalar_prefetch=0,
            grid=(num_tiles,),
            in_specs=[
                pl.BlockSpec((1, D), lambda i: (0, 0)),    # f32 weights (resident)
                pl.BlockSpec((tb, D), lambda i: (i, 0)),   # streamed batch tile
            ],
            out_specs=pl.BlockSpec((1, tb), lambda i: (0, i)),  # lane-dense slab
        ),
        compiler_params=pltpu.CompilerParams(
            dimension_semantics=("parallel",),             # megacore sharding
            vmem_limit_bytes=vmem_limit_bytes,
        ),
        cost_estimate=pl.CostEstimate(
            flops=2 * B * D,
            transcendentals=0,
            bytes_accessed=B * D * x.dtype.itemsize + 4 * D + 4 * B,
        ),
    )(w2d, x)
    return out[0, :B]   # (B,) — matches torch.sum(x * weights, dim=1) for 2-D x


if __name__ == "__main__":
    key = jax.random.PRNGKey(0)
    k_w, k_x, k_w2, k_x2 = jax.random.split(key, 4)

    # Test 1: small f32 case (exercises the single partial block, B < 128).
    batch, input_dim = 8, 128
    attention_weights = jax.random.normal(k_w, (input_dim,), dtype=jnp.float32)
    x = jax.random.normal(k_x, (batch, input_dim), dtype=jnp.float32)

    out = jax.block_until_ready(attention_forward(x, attention_weights))
    ref = jnp.sum(x * jax.nn.softmax(attention_weights, axis=0), axis=1)
    assert out.shape == (batch,)
    assert jnp.allclose(out, ref, atol=1e-5, rtol=1e-5)

    # Test 2: ragged multi-tile bf16 case (exercises mask + partial last block).
    batch2, input_dim2 = 260, 256
    w2 = jax.random.normal(k_w2, (input_dim2,), dtype=jnp.float32)
    x2 = jax.random.normal(k_x2, (batch2, input_dim2), dtype=jnp.float32).astype(jnp.bfloat16)

    out2 = jax.block_until_ready(attention_forward(x2, w2))
    ref2 = jnp.sum(x2.astype(jnp.float32) * jax.nn.softmax(w2, axis=0), axis=1)
    assert out2.shape == (batch2,)
    assert jnp.allclose(out2, ref2, atol=2e-3, rtol=1e-3)

    print("KERNEL_OK")
</pallas_src>

<mosaic_0001>
module attributes {stable_mosaic.version = 11 : i64} {
  func.func @kernel(%arg0: i32, %arg1: memref<1x128xf32, #tpu.memory_space<vmem>>, %arg2: memref<128x128xf32, #tpu.memory_space<vmem>>, %arg3: memref<1x128xf32, #tpu.memory_space<vmem>>) attributes {dimension_semantics = [#tpu.dimension_semantics<parallel>], iteration_bounds = array<i64: 1>, scalar_prefetch = 0 : i64, scratch_operands = 0 : i64, tpu.core_type = #tpu.core_type<tc>, window_params = [{pipeline_mode = #tpu.pipeline_mode<synchronous>, transform_indices = @transform_0, window_bounds = array<i64: 1, 128>}, {transform_indices = @transform_1, window_bounds = array<i64: 128, 128>}, {transform_indices = @transform_2, window_bounds = array<i64: 1, 128>}]} {
    %c0 = arith.constant 0 : index
    %c0_0 = arith.constant 0 : index
    %0 = vector.load %arg2[%c0, %c0_0] : memref<128x128xf32, #tpu.memory_space<vmem>>, vector<128x128xf32>
    %c0_1 = arith.constant 0 : index
    %c0_2 = arith.constant 0 : index
    %1 = vector.load %arg1[%c0_1, %c0_2] : memref<1x128xf32, #tpu.memory_space<vmem>>, vector<1x128xf32>
    %2 = vector.broadcast %1 : vector<1x128xf32> to vector<128x128xf32>
    %3 = arith.mulf %0, %2 : vector<128x128xf32>
    %c128_i32 = arith.constant 128 : i32
    %4 = arith.muli %arg0, %c128_i32 : i32
    %5 = tpu.iota {dimensions = array<i32: 0>} : vector<128x128xi32>
    %6 = vector.broadcast %4 : i32 to vector<128x128xi32>
    %7 = arith.addi %6, %5 : vector<128x128xi32>
    %c8_i32 = arith.constant 8 : i32
    %8 = vector.broadcast %c8_i32 : i32 to vector<128x128xi32>
    %9 = arith.cmpi slt, %7, %8 : vector<128x128xi32>
    %cst = arith.constant 0.000000e+00 : f32
    %10 = vector.broadcast %cst : f32 to vector<128x128xf32>
    %11 = arith.select %9, %3, %10 : vector<128x128xi1>, vector<128x128xf32>
    %cst_3 = arith.constant dense<0.000000e+00> : vector<128xf32>
    %12 = vector.multi_reduction <add>, %11, %cst_3 [1] : vector<128x128xf32> to vector<128xf32>
    %13 = vector.shape_cast %12 : vector<128xf32> to vector<1x128xf32>
    %c0_4 = arith.constant 0 : index
    %c0_5 = arith.constant 0 : index
    %14 = vector.load %arg3[%c0_4, %c0_5] : memref<1x128xf32, #tpu.memory_space<vmem>>, vector<1x128xf32>
    tpu.vector_store %arg3[%c0_4, %c0_5], %13 {strides = array<i32>} : memref<1x128xf32, #tpu.memory_space<vmem>>, vector<1x128xf32>,
    return
  }
  func.func @transform_0(%arg0: i32) -> (i32, i32) {
    %c0_i32 = arith.constant 0 : i32
    %c0_i32_0 = arith.constant 0 : i32
    %c0_i32_1 = arith.constant 0 : i32
    return %c0_i32, %c0_i32_0 : i32, i32
  }
  func.func @transform_1(%arg0: i32) -> (i32, i32) {
    %c0_i32 = arith.constant 0 : i32
    %c0_i32_0 = arith.constant 0 : i32
    return %arg0, %c0_i32 : i32, i32
  }
  func.func @transform_2(%arg0: i32) -> (i32, i32) {
    %c0_i32 = arith.constant 0 : i32
    %c0_i32_0 = arith.constant 0 : i32
    return %c0_i32, %arg0 : i32, i32
  }
}

</mosaic_0001>

<bundles_post_ra>
// kernel: tpu_custom_call.1
= control target key start
LH: loop header
LB: loop body
LE: loop exit
PB: predicated region body
PF: predicated region fallthrough
CT: control target
= control target key end

     0   :  { %7 = vsyncpa [#allocation3], 0  ;;  %s464_s0 = inlined_call_operand.hbm [shape: f32[1,128], index: 0, kind: input, shape index: {}]   ;;  %s465_s1 = inlined_call_operand.hbm [shape: f32[8,128], index: 1, kind: input, shape index: {}]   ;;  %s466_s2 = inlined_call_operand.hbm [shape: f32[1,128], index: 2, kind: output, shape index: {}]  }
   0x1   :  { %8 = vsyncpa [#allocation6], 0 }
   0x2   :  { %9 = vsyncpa [#allocation4], 0  ;;  %s394_s9 = smov [#allocation2]  }
   0x3   :  { %s16_s10 = sshll.u32 %s394_s9, 4  ;;  %s17_s10 = int_to_ptr.vmem [resolvable:$true] %s16_s10 }
   0x4   :  { %s336_s11 = scalar_lea.vmem %s17_s10, 16  ;;  %s340_s12 = scalar_lea.vmem %s17_s10, 32 }
   0x5   :  { %p337_p0 = scmp.ne.s32.totalorder %s17_s10, %s336_s11  ;;  %p341_p1 = scmp.lt.s32.totalorder %s17_s10, %s17_s10 }
   0x6   :  { %p342_p2 = scmp.lt.s32.totalorder %s340_s12, %s336_s11 }
   0x8   :  { %p343_p3 = por %p342_p2, %p341_p1 }
   0xa   :  { %p344_p4 = pnand %p343_p3, %p337_p0 }
   0xc   :  { %347 = shalt.err (!%p344_p4)
}
   0xd   :  { %19 = dma.hbm_to_vmem [thread:$0]  %s464_s0, 16, %s17_s10, [#allocation3]  }
   0xe   :  { %24 = vsyncadd [#allocation6], 1920  ;;  %s395_s15 = smov [#allocation5]  }
   0xf   :  { %s25_s16 = sshll.u32 %s395_s15, 4  ;;  %s26_s16 = int_to_ptr.vmem [resolvable:$true] %s25_s16 }
  0x10   :  { %s356_s17 = scalar_lea.vmem %s26_s16, 128  ;;  %s360_s18 = scalar_lea.vmem %s26_s16, 2048 }
  0x11   :  { %p357_p5 = scmp.ne.s32.totalorder %s26_s16, %s356_s17  ;;  %p361_p6 = scmp.lt.s32.totalorder %s26_s16, %s26_s16 }
  0x12   :  { %p362_p7 = scmp.lt.s32.totalorder %s360_s18, %s356_s17 }
  0x14   :  { %p363_p8 = por %p362_p7, %p361_p6 }
  0x16   :  { %p364_p9 = pnand %p363_p8, %p357_p5 }
  0x18   :  { %367 = shalt.err (!%p364_p9)
}
  0x19   :  { %s396_s19 = smov 128   ;;  %s397_s20 = smov 8  }
  0x1a   :  { %31 = dma.hbm_to_vmem [thread:$0]  %s465_s1, 128, %s26_s16, [#allocation6], %s396_s19, %s396_s19, %s397_s20  }
  0x1b   :  { %388 = dma.done.wait [#allocation3], 16  }
  0x1c   :  { %389 = vsyncadd [#allocation3], 4294967280 }
  0x1d   :  { %390 = dma.done.wait [#allocation6], 2048  }
  0x1e   :  { %391 = vsyncadd [#allocation6], 4294965248  ;;  %v398_v0 = vmov 0.0   ;;  %v38_v1 = vld [vmem:[#allocation5] sm:$0xff]  ;;  %v321_v2 = vld [vmem:[#allocation2] ss:$0 sm:$0xff]  ;;  %v192_v4 = vlaneseq }
  0x1f   :  { %146 = vadd.xlane.f32.xlu0 %v398_v0  ;;  %148 = vadd.xlane.f32.xlu1 %v398_v0  ;;  %v61_v3 = vmul.f32 %v321_v2, %v38_v1  ;;  %vm203_vm0 = vcmask 130112   ;;  %vm210_vm1 = vcmask 195712   ;;  %vm217_vm2 = vcmask 261312   ;;  %s399_s0 = smov [#allocation7]  }
  0x20   :  { %v421_v5 = vand.u32 127, %v192_v4  ;;  %v423_v8 = vshrl.u32 %v192_v4, 7  ;;  %vm224_vm3 = vcmask 326912   ;;  %vm231_vm4 = vcmask 392512   ;;  %s311_s1 = sshll.u32 %s399_s0, 4  ;;  %s312_s1 = int_to_ptr.vmem [resolvable:$true] %s311_s1 }
  0x21   :  { %vm238_vm5 = vcmask 458112   ;;  %vm245_vm6 = vcmask 523712   ;;  %vm252_vm7 = vcmask 589312   ;;  %vm259_vm8 = vcmask 654912   ;;  %s368_s23 = scalar_lea.vmem %s312_s1, 16  ;;  %s372_s24 = scalar_lea.vmem %s312_s1, 32 }
  0x22   :  { %v198_v9 = vadd.s32 4294967288, %v421_v5  ;;  %v205_v10 = vadd.s32 4294967280, %v421_v5  ;;  %v219_v11 = vadd.s32 4294967264, %v421_v5  ;;  %v212_v13 = vadd.s32 4294967272, %v421_v5  ;;  %p369_p10 = scmp.ne.s32.totalorder %s312_s1, %s368_s23  ;;  %p373_p11 = scmp.lt.s32.totalorder %s312_s1, %s312_s1 }
  0x23   :  { %152 = vadd.xlane.f32.xlu0 %v398_v0  ;;  %150 = vadd.xlane.f32.xlu1 %v398_v0  ;;  %v226_v15 = vadd.s32 4294967256, %v421_v5  ;;  %v196_v17 = vsub.s32 %v421_v5, %v423_v8  ;;  %v233_v18 = vadd.s32 4294967248, %v421_v5  ;;  %v240_v19 = vadd.s32 4294967240, %v421_v5  ;;  %p374_p12 = scmp.lt.s32.totalorder %s372_s24, %s368_s23 }
  0x24   :  { %v201_v16 = vsub.s32 %v198_v9, %v423_v8  ;;  %v208_v20 = vsub.s32 %v205_v10, %v423_v8  ;;  %v222_v21 = vsub.s32 %v219_v11, %v423_v8  ;;  %v215_v22 = vsub.s32 %v212_v13, %v423_v8 }
  0x25   :  { %v229_v25 = vsub.s32 %v226_v15, %v423_v8  ;;  %v247_v26 = vadd.s32 4294967232, %v421_v5  ;;  %v236_v29 = vsub.s32 %v233_v18, %v423_v8  ;;  %v243_v30 = vsub.s32 %v240_v19, %v423_v8  ;;  %p375_p13 = por %p374_p12, %p373_p11 }
  0x26   :  { %v254_v32 = vadd.s32 4294967224, %v421_v5  ;;  %v261_v40 = vadd.s32 4294967216, %v421_v5  ;;  %v268_v47 = vadd.s32 4294967208, %v421_v5  ;;  %v275_v55 = vadd.s32 4294967200, %v421_v5 }
  0x27   :  { %154 = vadd.xlane.f32.xlu1 %v398_v0  ;;  %144 = vadd.xlane.f32.xlu0 %v61_v3  ;;  %v250_v39 = vsub.s32 %v247_v26, %v423_v8  ;;  %v282_v58 = vadd.s32 4294967192, %v421_v5  ;;  %vm266_vm9 = vcmask 720512   ;;  %v296_v62 = vadd.s32 4294967176, %v421_v5  ;;  %p376_p0 = pnand %p375_p13, %p369_p10 }
  0x28   :  { %v257_v46 = vsub.s32 %v254_v32, %v423_v8  ;;  %v264_v54 = vsub.s32 %v261_v40, %v423_v8  ;;  %v271_v57 = vsub.s32 %v268_v47, %v423_v8  ;;  %v289_v1 = vadd.s32 4294967184, %v421_v5 }
  0x29   :  { %v285_v4 = vsub.s32 %v282_v58, %v423_v8  ;;  %vm273_vm10 = vcmask 786112   ;;  %vm280_vm11 = vcmask 851712   ;;  %v299_v10 = vsub.s32 %v296_v62, %v423_v8 }
  0x2a   :  { %vm287_vm12 = vcmask 917312   ;;  %vm294_vm13 = vcmask 982912   ;;  %vm301_vm14 = vcmask 1048512  }
  0x2b   :  { %158 = vadd.xlane.f32.xlu1 %v398_v0  ;;  %156 = vadd.xlane.f32.xlu0 %v398_v0 }
  0x2f   :  { %162 = vadd.xlane.f32.xlu1 %v398_v0  ;;  %160 = vadd.xlane.f32.xlu0 %v398_v0 }
  0x33   :  { %166 = vadd.xlane.f32.xlu1 %v398_v0  ;;  %164 = vadd.xlane.f32.xlu0 %v398_v0 }
  0x37   :  { %170 = vadd.xlane.f32.xlu1 %v398_v0  ;;  %168 = vadd.xlane.f32.xlu0 %v398_v0 }
  0x3b   :  { %174 = vadd.xlane.f32.xlu1 %v398_v0  ;;  %172 = vadd.xlane.f32.xlu0 %v398_v0  ;;  %v278_v0 = vsub.s32 %v275_v55, %v423_v8 }
  0xa8   :  { %v147_v6 = vpop.xlane.xlu0 %146  ;;  %v149_v7 = vpop.xlane.xlu1 %148 }
  0xa9   :  { %v202_v27 = vrot.slane %v147_v6, %v201_v16  ;;  %v209_v31 = vrot.slane %v149_v7, %v208_v20 }
  0xac   :  { %v153_v12 = vpop.xlane.xlu0 %152  ;;  %v151_v14 = vpop.xlane.xlu1 %150 }
  0xad   :  { %v216_v33 = vrot.slane %v151_v14, %v215_v22  ;;  %v223_v36 = vrot.slane %v153_v12, %v222_v21  ;;  %v292_v12 = vsub.s32 %v289_v1, %v423_v8 }
  0xb0   :  { %v155_v23 = vpop.xlane.xlu1 %154  ;;  %v145_v24 = vpop.xlane.xlu0 %144 }
  0xb1   :  { %v197_v28 = vrot.slane %v145_v24, %v196_v17  ;;  %v230_v42 = vrot.slane %v155_v23, %v229_v25 }
  0xb3   :  { %v204_v34 = vsel %vm203_vm0, %v202_v27, %v197_v28 }
  0xb4   :  { %v159_v35 = vpop.xlane.xlu1 %158  ;;  %v211_v37 = vsel %vm210_vm1, %v209_v31, %v204_v34  ;;  %v157_v38 = vpop.xlane.xlu0 %156 }
  0xb5   :  { %v218_v41 = vsel %vm217_vm2, %v216_v33, %v211_v37  ;;  %v237_v43 = vrot.slane %v157_v38, %v236_v29  ;;  %v244_v44 = vrot.slane %v159_v35, %v243_v30 }
  0xb6   :  { %v225_v45 = vsel %vm224_vm3, %v223_v36, %v218_v41 }
  0xb7   :  { %v232_v48 = vsel %vm231_vm4, %v230_v42, %v225_v45 }
  0xb8   :  { %v163_v49 = vpop.xlane.xlu1 %162  ;;  %v239_v50 = vsel %vm238_vm5, %v237_v43, %v232_v48  ;;  %v161_v51 = vpop.xlane.xlu0 %160 }
  0xb9   :  { %v246_v52 = vsel %vm245_vm6, %v244_v44, %v239_v50  ;;  %v251_v53 = vrot.slane %v161_v51, %v250_v39  ;;  %v258_v56 = vrot.slane %v163_v49, %v257_v46 }
  0xbb   :  { %v253_v59 = vsel %vm252_vm7, %v251_v53, %v246_v52 }
  0xbc   :  { %v167_v60 = vpop.xlane.xlu1 %166  ;;  %v165_v61 = vpop.xlane.xlu0 %164  ;;  %v260_v2 = vsel %vm259_vm8, %v258_v56, %v253_v59 }
  0xbd   :  { %v265_v63 = vrot.slane %v165_v61, %v264_v54  ;;  %v272_v3 = vrot.slane %v167_v60, %v271_v57 }
  0xbf   :  { %v267_v6 = vsel %vm266_vm9, %v265_v63, %v260_v2 }
  0xc0   :  { %v171_v7 = vpop.xlane.xlu1 %170  ;;  %v169_v9 = vpop.xlane.xlu0 %168  ;;  %v274_v13 = vsel %vm273_vm10, %v272_v3, %v267_v6 }
  0xc1   :  { %v279_v11 = vrot.slane %v169_v9, %v278_v0  ;;  %v286_v14 = vrot.slane %v171_v7, %v285_v4 }
  0xc3   :  { %v281_v15 = vsel %vm280_vm11, %v279_v11, %v274_v13 }
  0xc4   :  { %v175_v16 = vpop.xlane.xlu1 %174  ;;  %v173_v5 = vpop.xlane.xlu0 %172  ;;  %v288_v19 = vsel %vm287_vm12, %v286_v14, %v281_v15 }
  0xc5   :  { %v300_v17 = vrot.slane %v175_v16, %v299_v10  ;;  %v293_v18 = vrot.slane %v173_v5, %v292_v12 }
  0xc7   :  { %v295_v20 = vsel %vm294_vm13, %v293_v18, %v288_v19 }
  0xc8   :  { %v302_v21 = vsel %vm301_vm14, %v300_v17, %v295_v20 }
  0xc9   :  { %304 = vst [vmem:[#allocation7] sm:$0x1] %v302_v21 }
  0xca   :  { %379 = shalt.err (!%p376_p0)
}
  0xcb   :  { %314 = dma.vmem_to_hbm [thread:$0]  %s312_s1, 16, %s466_s2, [#allocation4]  }
  0xcc   :  { %392 = dma.done.wait [#allocation4], 16  }
  0xcd   :  { %393 = vsyncadd [#allocation4], 4294967280 }
  0xce   :  { %318 = vsyncpa [#allocation3], 1 }
  0xcf   :  { %319 = vsyncpa [#allocation6], 1 }
  0xd0   :  { %320 = vsyncpa [#allocation4], 1 }

</bundles_post_ra>
